<compile_context>
chip_gen: v6e
topology: v6e:2x2x1
jax: 0.10.0
libtpu: 0.0.40
codegen_flags: <defaults>
</compile_context>

<pallas_src>
import jax
import jax.numpy as jnp
from jax.experimental import pallas as pl
from jax.experimental.pallas import tpu as pltpu


def _round_up(n, m):
    return ((n + m - 1) // m) * m


def _fused_matmul_kernel(x_ref, w_ref, b_ref, o_ref):
    """o = x @ w + b for one row tile.

    x_ref: (TR, F) streamed, double-buffered   w_ref: (F, T) VMEM-resident
    b_ref: (1, T) f32 VMEM-resident            o_ref: (TR, T)
    x/w share one dtype (bf16 preferred) -> no in-kernel promotion of the
    streamed tile; accumulation is explicit f32 (preferred_element_type).
    """
    acc = jnp.dot(x_ref[...], w_ref[...], preferred_element_type=jnp.float32)
    o_ref[...] = (acc + b_ref[...]).astype(o_ref.dtype)


def _fold_conv_into_linear(conv_kernel, lin_w, *, H, W, padding):
    """Fold the shared (k,k) depthwise-conv kernel (and its zero padding) into
    the nn.Linear weight.  Returns W_eff of shape (H*W, T) in f32."""
    k = conv_kernel.shape[0]
    Hp, Wp = H + 2 * padding, W + 2 * padding
    Ho, Wo = Hp - k + 1, Wp - k + 1
    T = lin_w.shape[0]
    # lin_w is (T, Ho*Wo) in PyTorch layout -> (Ho, Wo, T)
    lw = lin_w.astype(jnp.float32).T.reshape(Ho, Wo, T)
    w_pad = jnp.zeros((Hp, Wp, T), jnp.float32)
    for di in range(k):
        for dj in range(k):
            w_pad = w_pad.at[di:di + Ho, dj:dj + Wo, :].add(
                conv_kernel[di, dj].astype(jnp.float32) * lw)
    # Coefficients of the *unpadded* input pixels (out-of-bounds taps vanish),
    # so no jnp.pad of the activation is ever materialized.
    w_eff = w_pad[padding:padding + H, padding:padding + W, :]
    return w_eff.reshape(H * W, T)


def _vmem_budget():
    """Generation-aware VMEM sizing.  Fallback assumes the smallest per-TC
    VMEM of the supported generations (v7x: 64 MiB)."""
    try:
        cap = int(pltpu.get_tpu_info().vmem_capacity_bytes)
    except Exception:
        cap = 64 * 1024 * 1024
    vmem_limit = (cap * 3) // 4      # requested scoped-VMEM limit (headroom left)
    buffer_budget = (cap * 6) // 10  # what the tile chooser may spend on buffers
    return buffer_budget, vmem_limit


def _choose_row_tile(R, F, T, x_itemsize, w_itemsize, out_itemsize, budget):
    """Largest row tile (multiple of 8) whose *physical* VMEM footprint fits.

    Physical accounting: the lane dim of every VMEM block is padded to a
    multiple of 128 (the (tr, T=8) out block really occupies (tr, 128)), the
    streamed x and out blocks are double-buffered, and the VMEM-resident
    w_eff / bias blocks (which Pallas still double-buffers) are counted too.
    """
    F_l = _round_up(F, 128)
    T_l = _round_up(T, 128)
    resident = 2 * (_round_up(F, 16) * T_l * w_itemsize + 8 * T_l * 4)
    per_row = 2 * (F_l * x_itemsize + T_l * out_itemsize)   # 2x: double buffering
    tr_budget = max(8, (budget - resident) // per_row)
    # Keep each streamed x buffer <= ~16 MiB; beyond that the ~0.35us per-step
    # overhead is already <1% of the DMA time on every generation.
    tr_bytes = max(8, (16 * 1024 * 1024) // (F_l * x_itemsize))
    # v7x megacore: guarantee >=4 grid steps (>=2 minimum) when R allows, so
    # dimension_semantics=("parallel",) can shard rows across both TensorCores.
    if R >= 4 * 8:
        min_steps = 4
    elif R >= 2 * 8:
        min_steps = 2
    else:
        min_steps = 1
    tr_cores = max(8, (pl.cdiv(R, min_steps) // 8) * 8) if min_steps > 1 else R
    tr = min(tr_budget, tr_bytes, tr_cores)
    if tr >= R:
        return R                      # full array dim: always a legal block
    step = 16 if tr >= 16 else 8      # 16-row granularity is packing-friendly for bf16
    return max(8, (tr // step) * step)


def prompt_down_sample(x, conv_kernel, lin_w, lin_b, *, padding=0, compute_dtype=None):
    """Pallas implementation of PromptDownSample.forward (inference).

    x           : (B, C, H, W)  NCHW, f32 or bf16
    conv_kernel : (k, k)        shared channelwise conv kernel
    lin_w       : (T, Ho*Wo)    PyTorch nn.Linear weight layout
    lin_b       : (T,)
    compute_dtype: dtype of the MXU matmul operands; defaults to x.dtype so
                   the dot is never mixed-dtype.  Pass jnp.bfloat16 (or supply
                   bf16 x) to halve HBM read traffic on this memory-bound op.
    returns     : (B, C, T) in x.dtype
    """
    B, C, H, W = x.shape
    T = lin_w.shape[0]
    R, F = B * C, H * W

    compute_dtype = jnp.dtype(compute_dtype) if compute_dtype is not None else x.dtype
    out_dtype = x.dtype

    # Fold the conv (and its zero padding) into the linear weight, then cast
    # to the compute dtype so both MXU operands match (no implicit promotion,
    # no multi-pass f32 MXU path when bf16 is used).
    w_eff = _fold_conv_into_linear(
        conv_kernel, lin_w, H=H, W=W, padding=padding).astype(compute_dtype)
    # Bias is added to the f32 accumulator (VPU add), so keep it f32.
    bias = lin_b.astype(jnp.float32).reshape(1, T)

    # Contiguous reshape (no relayout): NCHW -> (B*C, H*W).
    x_flat = x.reshape(R, F).astype(compute_dtype)

    budget, vmem_limit = _vmem_budget()
    tr = _choose_row_tile(R, F, T,
                          x_flat.dtype.itemsize, w_eff.dtype.itemsize,
                          jnp.dtype(out_dtype).itemsize, budget)
    grid = (pl.cdiv(R, tr),)

    # Advisory cost estimate so XLA schedules surrounding ops around this
    # memory-bound custom call correctly.
    cost = pl.CostEstimate(
        flops=2 * R * F * T,
        transcendentals=0,
        bytes_accessed=(R * F * x_flat.dtype.itemsize
                        + R * T * jnp.dtype(out_dtype).itemsize
                        + F * T * w_eff.dtype.itemsize),
    )

    out = pl.pallas_call(
        _fused_matmul_kernel,
        out_shape=jax.ShapeDtypeStruct((R, T), out_dtype),
        grid=grid,
        in_specs=[
            # Streamed row tiles (double-buffered).  NOTE: left at the default
            # buffer depth; bump to pl.Buffered(3) only if an xprof/bundle
            # check on v5e shows exposed DMA between steps (costs VMEM on v7x).
            pl.BlockSpec((tr, F), lambda i: (i, 0)),
            # w_eff / bias: constant index_map -> Pallas fetches them once and
            # keeps them VMEM-resident across the grid (their footprint is
            # accounted for in _choose_row_tile).
            pl.BlockSpec((F, T), lambda i: (0, 0)),
            pl.BlockSpec((1, T), lambda i: (0, 0)),
        ],
        # Output kept (tr, T) lane-sparse: it is ~F/T x smaller than the
        # streamed input so masked stores are nowhere near the bottleneck, and
        # an in-kernel (tr,8)->(tr/16,128) relayout would spend XLU /
        # vector-extended slots shared with the MXU pushes.  Its 128-lane VMEM
        # padding *is* charged in the tile-size accounting above.
        out_specs=pl.BlockSpec((tr, T), lambda i: (i, 0)),
        compiler_params=pltpu.CompilerParams(
            dimension_semantics=("parallel",),   # rows independent -> 2 TCs on v7x
            vmem_limit_bytes=vmem_limit,
        ),
        cost_estimate=cost,
    )(x_flat, w_eff, bias)

    # Dropout2d(p=0.1) is identity at inference time.
    # TODO(synk): training-mode channel dropout (random per-(B,C) mask) not implemented.
    return out.reshape(B, C, T)


def _reference(x, conv_kernel, lin_w, lin_b, padding=0):
    B, C, H, W = x.shape
    k = conv_kernel.shape[0]
    Ho = H + 2 * padding - k + 1
    Wo = W + 2 * padding - k + 1
    xp = jnp.pad(x, ((0, 0), (0, 0), (padding, padding), (padding, padding)))
    conv = jnp.zeros((B, C, Ho, Wo), jnp.float32)
    for di in range(k):
        for dj in range(k):
            conv = conv + conv_kernel[di, dj] * xp[:, :, di:di + Ho, dj:dj + Wo]
    return conv.reshape(B, C, -1) @ lin_w.T + lin_b


if __name__ == "__main__":
    # Small shapes consistent with the module: prompt_dim == C.
    B, C, H, W = 2, 4, 16, 16
    num_tokens, kern = 8, 2

    key = jax.random.PRNGKey(0)
    for pad in (0, 1):                      # exercise both padding paths
        Ho = H + 2 * pad - kern + 1
        Wo = W + 2 * pad - kern + 1
        Fo = Ho * Wo
        k1, k2, k3, k4, key = jax.random.split(key, 5)
        x = jax.random.normal(k1, (B, C, H, W), jnp.float32)
        conv_k = jax.random.normal(k2, (kern, kern), jnp.float32)  # torch.randn(1,1,k,k)
        # NOTE: the PyTorch module zero-inits the linear layer; we use small
        # deterministic non-zero values so the matmul path is actually exercised.
        lin_w = 0.02 * jax.random.normal(k3, (num_tokens, Fo), jnp.float32)
        lin_b = 0.01 * jax.random.normal(k4, (num_tokens,), jnp.float32)

        # f32 path (matched-dtype f32xf32 dot), tight tolerance.
        out = prompt_down_sample(x, conv_k, lin_w, lin_b, padding=pad)
        out = jax.block_until_ready(out)
        ref = _reference(x, conv_k, lin_w, lin_b, padding=pad)
        assert out.shape == (B, C, num_tokens), out.shape
        err = float(jnp.max(jnp.abs(out - ref)))
        assert jnp.allclose(out, ref, atol=5e-4, rtol=5e-4), err

        # bf16 fast path (halved HBM read traffic, native bf16 MXU), looser tol.
        x_bf = x.astype(jnp.bfloat16)
        out_bf = prompt_down_sample(x_bf, conv_k, lin_w, lin_b, padding=pad)
        out_bf = jax.block_until_ready(out_bf)
        ref_bf = _reference(x_bf.astype(jnp.float32), conv_k, lin_w, lin_b, padding=pad)
        err_bf = float(jnp.max(jnp.abs(out_bf.astype(jnp.float32) - ref_bf)))
        assert jnp.allclose(out_bf.astype(jnp.float32), ref_bf,
                            atol=2e-2, rtol=2e-2), err_bf

    print("KERNEL_OK")
</pallas_src>

<mosaic_0001>
module attributes {stable_mosaic.version = 11 : i64} {
  func.func @_fused_matmul_kernel(%arg0: i32, %arg1: memref<8x256xf32, #tpu.memory_space<vmem>>, %arg2: memref<256x8xf32, #tpu.memory_space<vmem>>, %arg3: memref<1x8xf32, #tpu.memory_space<vmem>>, %arg4: memref<8x8xf32, #tpu.memory_space<vmem>>) attributes {dimension_semantics = [#tpu.dimension_semantics<parallel>], iteration_bounds = array<i64: 1>, scalar_prefetch = 0 : i64, scratch_operands = 0 : i64, tpu.core_type = #tpu.core_type<tc>, window_params = [{transform_indices = @transform_0, window_bounds = array<i64: 8, 256>}, {pipeline_mode = #tpu.pipeline_mode<synchronous>, transform_indices = @transform_1, window_bounds = array<i64: 256, 8>}, {pipeline_mode = #tpu.pipeline_mode<synchronous>, transform_indices = @transform_2, window_bounds = array<i64: 1, 8>}, {transform_indices = @transform_3, window_bounds = array<i64: 8, 8>}]} {
    %c0 = arith.constant 0 : index
    %c0_0 = arith.constant 0 : index
    %0 = vector.load %arg1[%c0, %c0_0] : memref<8x256xf32, #tpu.memory_space<vmem>>, vector<8x256xf32>
    %c0_1 = arith.constant 0 : index
    %c0_2 = arith.constant 0 : index
    %1 = vector.load %arg2[%c0_1, %c0_2] : memref<256x8xf32, #tpu.memory_space<vmem>>, vector<256x8xf32>
    %cst = arith.constant dense<0.000000e+00> : vector<8x8xf32>
    %2 = tpu.matmul %0, %1, %cst {dimension_numbers = #tpu.dot_dimension_numbers<[1], [0], [0], [1], [0, 0, 1, 1], [], []>} : vector<8x256xf32>, vector<256x8xf32>, vector<8x8xf32> -> vector<8x8xf32>
    %c0_3 = arith.constant 0 : index
    %c0_4 = arith.constant 0 : index
    %3 = vector.load %arg3[%c0_3, %c0_4] : memref<1x8xf32, #tpu.memory_space<vmem>>, vector<1x8xf32>
    %4 = vector.broadcast %3 : vector<1x8xf32> to vector<8x8xf32>
    %5 = arith.addf %2, %4 : vector<8x8xf32>
    %c0_5 = arith.constant 0 : index
    %c0_6 = arith.constant 0 : index
    %6 = vector.load %arg4[%c0_5, %c0_6] : memref<8x8xf32, #tpu.memory_space<vmem>>, vector<8x8xf32>
    tpu.vector_store %arg4[%c0_5, %c0_6], %5 {strides = array<i32>} : memref<8x8xf32, #tpu.memory_space<vmem>>, vector<8x8xf32>,
    return
  }
  func.func @transform_0(%arg0: i32) -> (i32, i32) {
    %c0_i32 = arith.constant 0 : i32
    %c0_i32_0 = arith.constant 0 : i32
    return %arg0, %c0_i32 : i32, i32
  }
  func.func @transform_1(%arg0: i32) -> (i32, i32) {
    %c0_i32 = arith.constant 0 : i32
    %c0_i32_0 = arith.constant 0 : i32
    %c0_i32_1 = arith.constant 0 : i32
    return %c0_i32, %c0_i32_0 : i32, i32
  }
  func.func @transform_2(%arg0: i32) -> (i32, i32) {
    %c0_i32 = arith.constant 0 : i32
    %c0_i32_0 = arith.constant 0 : i32
    %c0_i32_1 = arith.constant 0 : i32
    return %c0_i32, %c0_i32_0 : i32, i32
  }
  func.func @transform_3(%arg0: i32) -> (i32, i32) {
    %c0_i32 = arith.constant 0 : i32
    %c0_i32_0 = arith.constant 0 : i32
    return %arg0, %c0_i32 : i32, i32
  }
}

</mosaic_0001>

<bundles_post_ra>
// kernel: tpu_custom_call.1
= control target key start
LH: loop header
LB: loop body
LE: loop exit
PB: predicated region body
PF: predicated region fallthrough
CT: control target
= control target key end

     0   :  { %s330_s0 = inlined_call_operand.vmem [shape: f32[8,256], index: 0, kind: input, shape index: {}]   ;;  %s331_s1 = inlined_call_operand.vmem [shape: f32[256,8], index: 1, kind: input, shape index: {}]   ;;  %s332_s2 = inlined_call_operand.vmem [shape: f32[1,8], index: 2, kind: input, shape index: {}]   ;;  %s333_s3 = inlined_call_operand.hbm [shape: f32[8,8], index: 3, kind: output, shape index: {}]  }
   0x1   :  { %v48_v0 = vld [vmem:[%s331_s1 + $0xf8] sm:$0xff]  ;;  %v47_v2 = vld [vmem:[%s331_s1 + $0xf0] sm:$0xff]  ;;  %v46_v4 = vld [vmem:[%s331_s1 + $0xe8] sm:$0xff] }
   0x2   :  { %v32_v1 = vld [vmem:[%s331_s1 + $0x78] sm:$0xff]  ;;  %143 = vmatprep.subr.mxu0 %v48_v0  ;;  %v31_v3 = vld [vmem:[%s331_s1 + $0x70] sm:$0xff]  ;;  %v30_v5 = vld [vmem:[%s331_s1 + $0x68] sm:$0xff] }
   0x3   :  { %144 = vmatpush3.msra.mxu0 %v32_v1  ;;  %v45_v6 = vld [vmem:[%s331_s1 + $0xe0] sm:$0xff]  ;;  %v44_v8 = vld [vmem:[%s331_s1 + $0xd8] sm:$0xff]  ;;  %v43_v10 = vld [vmem:[%s331_s1 + $0xd0] sm:$0xff] }
   0x4   :  { %145 = vmatprep.subr.mxu0 %v47_v2  ;;  %v29_v7 = vld [vmem:[%s331_s1 + $0x60] sm:$0xff]  ;;  %v28_v9 = vld [vmem:[%s331_s1 + $0x58] sm:$0xff]  ;;  %v27_v11 = vld [vmem:[%s331_s1 + $0x50] sm:$0xff] }
   0x5   :  { %146 = vmatpush3.msra.mxu0 %v31_v3  ;;  %v42_v12 = vld [vmem:[%s331_s1 + $0xc8] sm:$0xff] }
   0x6   :  { %147 = vmatprep.subr.mxu0 %v46_v4  ;;  %v16_v13 = vld [vmem:[%s330_s0 + $0x8] sm:$0xff] }
   0x7   :  { %148 = vmatpush3.msra.mxu0 %v30_v5  ;;  %v26_v14 = vld [vmem:[%s331_s1 + $0x48] sm:$0xff]  ;;  %120 = vmatprep.mubr.f32.mxu0 %v16_v13 }
   0x8   :  { %149 = vmatprep.subr.mxu0 %v45_v6 }
   0x9   :  { %150 = vmatpush3.msra.mxu0 %v29_v7 }
   0xa   :  { %151 = vmatprep.subr.mxu0 %v44_v8 }
   0xb   :  { %152 = vmatpush3.msra.mxu0 %v28_v9 }
   0xc   :  { %153 = vmatprep.subr.mxu0 %v43_v10 }
   0xd   :  { %8 = vsyncpa [#allocation3], 0  ;;  %154 = vmatpush3.msra.mxu0 %v27_v11  ;;  %v41_v15 = vld [vmem:[%s331_s1 + $0xc0] sm:$0xff]  ;;  %v40_v17 = vld [vmem:[%s331_s1 + $0xb8] sm:$0xff]  ;;  %s201_s28 = smov [#allocation2]   ;;  %vm126_vm0 = vcmask 64512  }
   0xe   :  { %155 = vmatprep.subr.mxu0 %v42_v12  ;;  %v25_v16 = vld [vmem:[%s331_s1 + $0x40] sm:$0xff]  ;;  %v24_v18 = vld [vmem:[%s331_s1 + $0x38] sm:$0xff]  ;;  %v39_v19 = vld [vmem:[%s331_s1 + $0xb0] sm:$0xff]  ;;  %s134_s29 = sshll.u32 %s201_s28, 4  ;;  %s135_s29 = int_to_ptr.vmem [resolvable:$true] %s134_s29 }
   0xf   :  { %156 = vmatpush3.msra.mxu0 %v26_v14  ;;  %v23_v20 = vld [vmem:[%s331_s1 + $0x30] sm:$0xff]  ;;  %v38_v21 = vld [vmem:[%s331_s1 + $0xa8] sm:$0xff]  ;;  %v37_v23 = vld [vmem:[%s331_s1 + $0xa0] sm:$0xff]  ;;  %p184_p1 = scmp.lt.s32.totalorder %s135_s29, %s135_s29 }
  0x10   :  { %157 = vmatprep.subr.mxu0 %v41_v15  ;;  %v22_v22 = vld [vmem:[%s331_s1 + $0x28] sm:$0xff]  ;;  %v21_v24 = vld [vmem:[%s331_s1 + $0x20] sm:$0xff]  ;;  %v36_v25 = vld [vmem:[%s331_s1 + $0x98] sm:$0xff] }
  0x11   :  { %158 = vmatpush3.msra.mxu0 %v25_v16  ;;  %v20_v26 = vld [vmem:[%s331_s1 + $0x18] sm:$0xff]  ;;  %v35_v27 = vld [vmem:[%s331_s1 + $0x90] sm:$0xff]  ;;  %v34_v29 = vld [vmem:[%s331_s1 + $0x88] sm:$0xff] }
  0x12   :  { %159 = vmatprep.subr.mxu0 %v40_v17  ;;  %v19_v28 = vld [vmem:[%s331_s1 + $0x10] sm:$0xff]  ;;  %v18_v30 = vld [vmem:[%s331_s1 + $0x8] sm:$0xff]  ;;  %v33_v31 = vld [vmem:[%s331_s1 + $0x80] sm:$0xff] }
  0x13   :  { %160 = vmatpush3.msra.mxu0 %v24_v18  ;;  %v17_v32 = vld [vmem:[%s331_s1] sm:$0xff]  ;;  %s179_s1 = scalar_lea.vmem %s135_s29, 128 }
  0x14   :  { %161 = vmatprep.subr.mxu0 %v39_v19  ;;  %v15_v33 = vld [vmem:[%s330_s0] sm:$0xff]  ;;  %p180_p0 = scmp.ne.s32.totalorder %s135_s29, %s179_s1  ;;  %p185_p2 = scmp.lt.s32.totalorder %s179_s1, %s179_s1 }
  0x15   :  { %162 = vmatpush3.msra.mxu0 %v23_v20  ;;  %v142_v35 = vld [vmem:[%s332_s2] ss:$0 sm:$0xff] }
  0x16   :  { %163 = vmatprep.subr.mxu0 %v38_v21  ;;  %p186_p3 = por %p185_p2, %p184_p1 }
  0x17   :  { %164 = vmatpush3.msra.mxu0 %v22_v22 }
  0x18   :  { %165 = vmatprep.subr.mxu0 %v37_v23  ;;  %p187_p4 = pnand %p186_p3, %p180_p0 }
  0x19   :  { %166 = vmatpush3.msra.mxu0 %v21_v24 }
  0x1a   :  { %167 = vmatprep.subr.mxu0 %v36_v25 }
  0x1b   :  { %168 = vmatpush3.msra.mxu0 %v20_v26 }
  0x1c   :  { %169 = vmatprep.subr.mxu0 %v35_v27 }
  0x1d   :  { %170 = vmatpush3.msra.mxu0 %v19_v28 }
  0x1e   :  { %171 = vmatprep.subr.mxu0 %v34_v29 }
  0x1f   :  { %172 = vmatpush3.msra.mxu0 %v18_v30 }
  0x20   :  { %173 = vmatprep.subr.mxu0 %v33_v31 }
  0x21   :  { %174 = vmatpush3.msra.mxu0 %v17_v32 }
  0x22   :  { %121 = vmatmul.mubr.f32.vlgmr.msra.gmra.mxu0 %v15_v33 }
  0xe2   :  { %v175_v34 = vpop.f32.mrf.mxu0 }
  0xe4   :  { %v176_v36 = vpop.f32.mrf.mxu0 }
  0xe5   :  { %v177_v37 = vadd.f32 %v176_v36, %v175_v34 }
  0xe7   :  { %v123_v38 = vadd.f32 %v177_v37, %v142_v35 }
  0xe9   :  { %127 = vst.msk [vmem:[#allocation2] sm:$0xff] %vm126_vm0, %v123_v38 }
  0xea   :  { %190 = shalt.err (!%p187_p4)
}
  0xeb   :  { %137 = dma.vmem_to_hbm [thread:$0]  %s135_s29, 128, %s333_s3, [#allocation3]  }
  0xec   :  { %199 = dma.done.wait [#allocation3], 128  }
  0xed   :  { %200 = vsyncadd [#allocation3], 4294967168 }
  0xee   :  { %141 = vsyncpa [#allocation3], 1 }

</bundles_post_ra>
